<compile_context>
chip_gen: v5e
topology: v5e:2x2
jax: 0.10.0
libtpu: 0.0.40
codegen_flags: <defaults>
</compile_context>

<pallas_src>
import functools

import jax
import jax.numpy as jnp
import numpy as np
from jax import lax
from jax.experimental import pallas as pl
from jax.experimental.pallas import tpu as pltpu


# ---------------------------------------------------------------------------
# Pallas kernel: whole TCN forward for one batch element.
# ---------------------------------------------------------------------------
def _tcn_kernel(x_ref, *refs, levels, T):
    """refs = (per-level weight refs..., fc_w_ref, fc_b_ref, out_ref).

    Per level (in order): w1 (K, Cout, Cin) bf16, b1 (Cout, 1) f32,
                          w2 (K, Cout, Cout) bf16, b2 (Cout, 1) f32,
                          [wd (Cout, Cin) bf16, bd (Cout, 1) f32]  if Cin != Cout.
    x_ref:   (1, D, T) f32     out_ref: (1, 1, T) f32
    Activations live channels-on-sublanes / time-on-lanes: (C, T).
    """
    out_ref = refs[-1]
    w_refs = refs[:-1]

    def causal_conv(h_b, w_ref, b_ref, K, d, cin, cout):
        # Dilated causal conv == Conv1d(padding=(K-1)*d) followed by Chomp.
        # h_b: (cin, T) bf16  ->  (cout, T) f32 (pre-activation).
        pad = (K - 1) * d
        if pad > 0:
            hp_b = jnp.concatenate(
                [jnp.zeros((cin, pad), jnp.bfloat16), h_b], axis=1)
        else:
            hp_b = h_b
        acc = None
        for k in range(K):                       # static unroll over taps
            # The last tap (k*d == pad) is the unshifted slab itself.
            hk = h_b if k * d == pad else hp_b[:, k * d:k * d + T]
            term = jnp.dot(w_ref[k], hk, preferred_element_type=jnp.float32)
            acc = term if acc is None else acc + term
        return acc + b_ref[...]                  # bias broadcasts over T

    cur = x_ref[0].astype(jnp.float32)           # (D, T)
    idx = 0
    for (K, d, cin, cout, has_down) in levels:   # static unroll over levels
        w1_ref, b1_ref = w_refs[idx], w_refs[idx + 1]
        w2_ref, b2_ref = w_refs[idx + 2], w_refs[idx + 3]
        idx += 4
        cur_b = cur.astype(jnp.bfloat16)
        out1 = jax.nn.relu(
            causal_conv(cur_b, w1_ref, b1_ref, K, d, cin, cout))
        out2 = jax.nn.relu(
            causal_conv(out1.astype(jnp.bfloat16), w2_ref, b2_ref,
                        K, d, cout, cout))
        if has_down:                             # 1x1 conv residual
            wd_ref, bd_ref = w_refs[idx], w_refs[idx + 1]
            idx += 2
            res = jnp.dot(wd_ref[...], cur_b,
                          preferred_element_type=jnp.float32) + bd_ref[...]
        else:
            res = cur
        cur = jax.nn.relu(out2 + res)

    # Linear(C_last -> 1) on the VPU: broadcast-mul + channel (sublane)
    # reduction, producing a lane-dense (1, T) row.
    w_fc_ref, b_fc_ref = w_refs[idx], w_refs[idx + 1]
    out = jnp.sum(cur * w_fc_ref[...], axis=0, keepdims=True) + b_fc_ref[...]
    out_ref[...] = out.reshape(1, 1, T)


# ---------------------------------------------------------------------------
# Wrapper
# ---------------------------------------------------------------------------
def tcn_forward(x, params):
    """x: (batch, seq, num_inputs) -> (batch, seq, 1)."""
    B, T, D = x.shape
    # The module's own permute(0, 2, 1): channels-first for the convs.
    xt = jnp.transpose(x, (0, 2, 1))             # (B, D, T)

    # Flatten weights into kernel layout (channels-first matmul form) + meta.
    flat_inputs = []
    meta = []
    for i, lvl in enumerate(params["levels"]):
        w1 = lvl["w1"]                           # (Cout, Cin, K)
        cout, cin, K = w1.shape
        d = 2 ** i
        has_down = "wd" in lvl
        flat_inputs.append(
            jnp.transpose(w1, (2, 0, 1)).astype(jnp.bfloat16))         # (K,Cout,Cin)
        flat_inputs.append(lvl["b1"].reshape(cout, 1))
        flat_inputs.append(
            jnp.transpose(lvl["w2"], (2, 0, 1)).astype(jnp.bfloat16))  # (K,Cout,Cout)
        flat_inputs.append(lvl["b2"].reshape(cout, 1))
        if has_down:
            flat_inputs.append(lvl["wd"][:, :, 0].astype(jnp.bfloat16))  # (Cout,Cin)
            flat_inputs.append(lvl["bd"].reshape(cout, 1))
        meta.append((K, d, cin, cout, has_down))
    c_last = params["fc_w"].shape[1]
    flat_inputs.append(params["fc_w"].reshape(c_last, 1))              # (C_last,1)
    flat_inputs.append(params["fc_b"].reshape(1, 1))

    kernel = functools.partial(_tcn_kernel, levels=tuple(meta), T=T)

    def _const_map(ndim):
        return lambda b: (0,) * ndim

    in_specs = [pl.BlockSpec((1, D, T), lambda b: (b, 0, 0))]
    in_specs += [pl.BlockSpec(w.shape, _const_map(w.ndim)) for w in flat_inputs]
    out_specs = pl.BlockSpec((1, 1, T), lambda b: (b, 0, 0))

    out = pl.pallas_call(
        kernel,
        out_shape=jax.ShapeDtypeStruct((B, 1, T), jnp.float32),
        grid=(B,),
        in_specs=in_specs,
        out_specs=out_specs,
        compiler_params=pltpu.CompilerParams(
            dimension_semantics=("parallel",),
            vmem_limit_bytes=48 * 1024 * 1024),  # < v7x's 64 MiB, > v5e default
    )(xt, *flat_inputs)
    return out.reshape(B, T, 1)


# ---------------------------------------------------------------------------
# Deterministic parameter init mirroring the PyTorch module
#   conv weights ~ N(0, 0.01) (init_weights), biases ~ PyTorch default uniform.
#   weight_norm folded into the effective weight.
# ---------------------------------------------------------------------------
def init_tcn_params(key, num_inputs, channels, kernel_size):
    levels = []
    for i, cout in enumerate(channels):
        cin = num_inputs if i == 0 else channels[i - 1]
        key, k1, k2, k3, k4, k5, k6 = jax.random.split(key, 7)
        w1 = 0.01 * jax.random.normal(k1, (cout, cin, kernel_size), jnp.float32)
        b1_bound = 1.0 / np.sqrt(cin * kernel_size)
        b1 = jax.random.uniform(k2, (cout,), jnp.float32, -b1_bound, b1_bound)
        w2 = 0.01 * jax.random.normal(k3, (cout, cout, kernel_size), jnp.float32)
        b2_bound = 1.0 / np.sqrt(cout * kernel_size)
        b2 = jax.random.uniform(k4, (cout,), jnp.float32, -b2_bound, b2_bound)
        lvl = dict(w1=w1, b1=b1, w2=w2, b2=b2)
        if cin != cout:
            wd = 0.01 * jax.random.normal(k5, (cout, cin, 1), jnp.float32)
            bd_bound = 1.0 / np.sqrt(cin)
            bd = jax.random.uniform(k6, (cout,), jnp.float32, -bd_bound, bd_bound)
            lvl.update(wd=wd, bd=bd)
        levels.append(lvl)
    key, k7, k8 = jax.random.split(key, 3)
    c_last = channels[-1]
    fc_bound = 1.0 / np.sqrt(c_last)
    fc_w = jax.random.uniform(k7, (1, c_last), jnp.float32, -fc_bound, fc_bound)
    fc_b = jax.random.uniform(k8, (1,), jnp.float32, -fc_bound, fc_bound)
    return {"levels": levels, "fc_w": fc_w, "fc_b": fc_b}


# ---------------------------------------------------------------------------
# Pure-JAX reference (XLA Conv1d semantics, f32, for correctness check)
# ---------------------------------------------------------------------------
def tcn_reference(x, params):
    B, T, D = x.shape
    dn = ("NCH", "OIH", "NCH")

    def conv1d(h, w, b, dilation, padding):
        o = lax.conv_general_dilated(
            h, w, window_strides=(1,), padding=[(padding, padding)],
            rhs_dilation=(dilation,), dimension_numbers=dn)
        return o + b[None, :, None]

    y = jnp.transpose(x, (0, 2, 1))              # (B, C, T)
    for i, lvl in enumerate(params["levels"]):
        d = 2 ** i
        K = lvl["w1"].shape[-1]
        pad = (K - 1) * d
        out = jax.nn.relu(conv1d(y, lvl["w1"], lvl["b1"], d, pad)[:, :, :T])
        out = jax.nn.relu(conv1d(out, lvl["w2"], lvl["b2"], d, pad)[:, :, :T])
        res = conv1d(y, lvl["wd"], lvl["bd"], 1, 0) if "wd" in lvl else y
        y = jax.nn.relu(out + res)
    y = jnp.transpose(y, (0, 2, 1))              # (B, T, C_last)
    return jnp.dot(y, params["fc_w"].T) + params["fc_b"]


# ---------------------------------------------------------------------------
if __name__ == "__main__":
    batch, seq = 2, 16
    num_inputs = 4
    channels = [32, 32]          # two TemporalBlocks (dilations 1, 2)
    kernel_size = 3

    key = jax.random.PRNGKey(0)
    key, xkey = jax.random.split(key)
    x = jax.random.normal(xkey, (batch, seq, num_inputs), jnp.float32)

    params = init_tcn_params(key, num_inputs, channels, kernel_size)

    fwd = jax.jit(tcn_forward)
    out = jax.block_until_ready(fwd(x, params))

    ref = tcn_reference(x, params)
    assert out.shape == (batch, seq, 1)
    # bf16 matmul operands (f32 accumulation) -> loosened tolerances.
    np.testing.assert_allclose(np.asarray(out), np.asarray(ref),
                               rtol=2e-2, atol=1e-2)

    print("KERNEL_OK")
</pallas_src>

<mosaic_0001>
module attributes {stable_mosaic.version = 11 : i64} {
  func.func @_tcn_kernel(%arg0: i32, %arg1: memref<1x4x16xf32, #tpu.memory_space<vmem>>, %arg2: memref<3x32x4xbf16, #tpu.memory_space<vmem>>, %arg3: memref<32x1xf32, #tpu.memory_space<vmem>>, %arg4: memref<3x32x32xbf16, #tpu.memory_space<vmem>>, %arg5: memref<32x1xf32, #tpu.memory_space<vmem>>, %arg6: memref<32x4xbf16, #tpu.memory_space<vmem>>, %arg7: memref<32x1xf32, #tpu.memory_space<vmem>>, %arg8: memref<3x32x32xbf16, #tpu.memory_space<vmem>>, %arg9: memref<32x1xf32, #tpu.memory_space<vmem>>, %arg10: memref<3x32x32xbf16, #tpu.memory_space<vmem>>, %arg11: memref<32x1xf32, #tpu.memory_space<vmem>>, %arg12: memref<32x1xf32, #tpu.memory_space<vmem>>, %arg13: memref<1x1xf32, #tpu.memory_space<vmem>>, %arg14: memref<1x1x16xf32, #tpu.memory_space<vmem>>) attributes {dimension_semantics = [#tpu.dimension_semantics<parallel>], iteration_bounds = array<i64: 2>, scalar_prefetch = 0 : i64, scratch_operands = 0 : i64, tpu.core_type = #tpu.core_type<tc>, window_params = [{transform_indices = @transform_0, window_bounds = array<i64: 1, 4, 16>}, {pipeline_mode = #tpu.pipeline_mode<synchronous>, transform_indices = @transform_1, window_bounds = array<i64: 3, 32, 4>}, {pipeline_mode = #tpu.pipeline_mode<synchronous>, transform_indices = @transform_2, window_bounds = array<i64: 32, 1>}, {pipeline_mode = #tpu.pipeline_mode<synchronous>, transform_indices = @transform_3, window_bounds = array<i64: 3, 32, 32>}, {pipeline_mode = #tpu.pipeline_mode<synchronous>, transform_indices = @transform_4, window_bounds = array<i64: 32, 1>}, {pipeline_mode = #tpu.pipeline_mode<synchronous>, transform_indices = @transform_5, window_bounds = array<i64: 32, 4>}, {pipeline_mode = #tpu.pipeline_mode<synchronous>, transform_indices = @transform_6, window_bounds = array<i64: 32, 1>}, {pipeline_mode = #tpu.pipeline_mode<synchronous>, transform_indices = @transform_7, window_bounds = array<i64: 3, 32, 32>}, {pipeline_mode = #tpu.pipeline_mode<synchronous>, transform_indices = @transform_8, window_bounds = array<i64: 32, 1>}, {pipeline_mode = #tpu.pipeline_mode<synchronous>, transform_indices = @transform_9, window_bounds = array<i64: 3, 32, 32>}, {pipeline_mode = #tpu.pipeline_mode<synchronous>, transform_indices = @transform_10, window_bounds = array<i64: 32, 1>}, {pipeline_mode = #tpu.pipeline_mode<synchronous>, transform_indices = @transform_11, window_bounds = array<i64: 32, 1>}, {pipeline_mode = #tpu.pipeline_mode<synchronous>, transform_indices = @transform_12, window_bounds = array<i64: 1, 1>}, {transform_indices = @transform_13, window_bounds = array<i64: 1, 1, 16>}]} {
    %c0 = arith.constant 0 : index
    %c0_0 = arith.constant 0 : index
    %c0_1 = arith.constant 0 : index
    %0 = vector.load %arg1[%c0, %c0_0, %c0_1] : memref<1x4x16xf32, #tpu.memory_space<vmem>>, vector<1x4x16xf32>
    %1 = vector.shape_cast %0 : vector<1x4x16xf32> to vector<4x16xf32>
    %2 = arith.truncf %1 : vector<4x16xf32> to vector<4x16xbf16>
    %cst = arith.constant 0.000000e+00 : bf16
    %3 = vector.broadcast %cst : bf16 to vector<4x2xbf16>
    %4 = tpu.concatenate %3, %2 in 1 : vector<4x2xbf16>, vector<4x16xbf16> -> vector<4x18xbf16>
    %5 = vector.extract_strided_slice %4 {offsets = [0, 0], sizes = [4, 16], strides = [1, 1]} : vector<4x18xbf16> to vector<4x16xbf16>
    %c0_2 = arith.constant 0 : index
    %c0_3 = arith.constant 0 : index
    %c0_4 = arith.constant 0 : index
    %6 = vector.load %arg2[%c0_2, %c0_3, %c0_4] : memref<3x32x4xbf16, #tpu.memory_space<vmem>>, vector<1x32x4xbf16>
    %7 = vector.shape_cast %6 : vector<1x32x4xbf16> to vector<32x4xbf16>
    %cst_5 = arith.constant dense<0.000000e+00> : vector<32x16xf32>
    %8 = tpu.matmul %7, %5, %cst_5 {dimension_numbers = #tpu.dot_dimension_numbers<[1], [0], [0], [1], [0, 0, 1, 1], [], []>} : vector<32x4xbf16>, vector<4x16xbf16>, vector<32x16xf32> -> vector<32x16xf32>
    %9 = vector.extract_strided_slice %4 {offsets = [0, 1], sizes = [4, 16], strides = [1, 1]} : vector<4x18xbf16> to vector<4x16xbf16>
    %c1 = arith.constant 1 : index
    %c0_6 = arith.constant 0 : index
    %c0_7 = arith.constant 0 : index
    %10 = vector.load %arg2[%c1, %c0_6, %c0_7] : memref<3x32x4xbf16, #tpu.memory_space<vmem>>, vector<1x32x4xbf16>
    %11 = vector.shape_cast %10 : vector<1x32x4xbf16> to vector<32x4xbf16>
    %cst_8 = arith.constant dense<0.000000e+00> : vector<32x16xf32>
    %12 = tpu.matmul %11, %9, %cst_8 {dimension_numbers = #tpu.dot_dimension_numbers<[1], [0], [0], [1], [0, 0, 1, 1], [], []>} : vector<32x4xbf16>, vector<4x16xbf16>, vector<32x16xf32> -> vector<32x16xf32>
    %13 = arith.addf %8, %12 : vector<32x16xf32>
    %c2 = arith.constant 2 : index
    %c0_9 = arith.constant 0 : index
    %c0_10 = arith.constant 0 : index
    %14 = vector.load %arg2[%c2, %c0_9, %c0_10] : memref<3x32x4xbf16, #tpu.memory_space<vmem>>, vector<1x32x4xbf16>
    %15 = vector.shape_cast %14 : vector<1x32x4xbf16> to vector<32x4xbf16>
    %cst_11 = arith.constant dense<0.000000e+00> : vector<32x16xf32>
    %16 = tpu.matmul %15, %2, %cst_11 {dimension_numbers = #tpu.dot_dimension_numbers<[1], [0], [0], [1], [0, 0, 1, 1], [], []>} : vector<32x4xbf16>, vector<4x16xbf16>, vector<32x16xf32> -> vector<32x16xf32>
    %17 = arith.addf %13, %16 : vector<32x16xf32>
    %c0_12 = arith.constant 0 : index
    %c0_13 = arith.constant 0 : index
    %18 = vector.load %arg3[%c0_12, %c0_13] : memref<32x1xf32, #tpu.memory_space<vmem>>, vector<32x1xf32>
    %19 = vector.broadcast %18 : vector<32x1xf32> to vector<32x16xf32>
    %20 = arith.addf %17, %19 : vector<32x16xf32>
    %cst_14 = arith.constant 0.000000e+00 : f32
    %21 = vector.broadcast %cst_14 : f32 to vector<32x16xf32>
    %22 = arith.maximumf %20, %21 : vector<32x16xf32>
    %23 = arith.truncf %22 : vector<32x16xf32> to vector<32x16xbf16>
    %cst_15 = arith.constant 0.000000e+00 : bf16
    %24 = vector.broadcast %cst_15 : bf16 to vector<32x2xbf16>
    %25 = tpu.concatenate %24, %23 in 1 : vector<32x2xbf16>, vector<32x16xbf16> -> vector<32x18xbf16>
    %26 = vector.extract_strided_slice %25 {offsets = [0, 0], sizes = [32, 16], strides = [1, 1]} : vector<32x18xbf16> to vector<32x16xbf16>
    %c0_16 = arith.constant 0 : index
    %c0_17 = arith.constant 0 : index
    %c0_18 = arith.constant 0 : index
    %27 = vector.load %arg4[%c0_16, %c0_17, %c0_18] : memref<3x32x32xbf16, #tpu.memory_space<vmem>>, vector<1x32x32xbf16>
    %28 = vector.shape_cast %27 : vector<1x32x32xbf16> to vector<32x32xbf16>
    %cst_19 = arith.constant dense<0.000000e+00> : vector<32x16xf32>
    %29 = tpu.matmul %28, %26, %cst_19 {dimension_numbers = #tpu.dot_dimension_numbers<[1], [0], [0], [1], [0, 0, 1, 1], [], []>} : vector<32x32xbf16>, vector<32x16xbf16>, vector<32x16xf32> -> vector<32x16xf32>
    %30 = vector.extract_strided_slice %25 {offsets = [0, 1], sizes = [32, 16], strides = [1, 1]} : vector<32x18xbf16> to vector<32x16xbf16>
    %c1_20 = arith.constant 1 : index
    %c0_21 = arith.constant 0 : index
    %c0_22 = arith.constant 0 : index
    %31 = vector.load %arg4[%c1_20, %c0_21, %c0_22] : memref<3x32x32xbf16, #tpu.memory_space<vmem>>, vector<1x32x32xbf16>
    %32 = vector.shape_cast %31 : vector<1x32x32xbf16> to vector<32x32xbf16>
    %cst_23 = arith.constant dense<0.000000e+00> : vector<32x16xf32>
    %33 = tpu.matmul %32, %30, %cst_23 {dimension_numbers = #tpu.dot_dimension_numbers<[1], [0], [0], [1], [0, 0, 1, 1], [], []>} : vector<32x32xbf16>, vector<32x16xbf16>, vector<32x16xf32> -> vector<32x16xf32>
    %34 = arith.addf %29, %33 : vector<32x16xf32>
    %c2_24 = arith.constant 2 : index
    %c0_25 = arith.constant 0 : index
    %c0_26 = arith.constant 0 : index
    %35 = vector.load %arg4[%c2_24, %c0_25, %c0_26] : memref<3x32x32xbf16, #tpu.memory_space<vmem>>, vector<1x32x32xbf16>
    %36 = vector.shape_cast %35 : vector<1x32x32xbf16> to vector<32x32xbf16>
    %cst_27 = arith.constant dense<0.000000e+00> : vector<32x16xf32>
    %37 = tpu.matmul %36, %23, %cst_27 {dimension_numbers = #tpu.dot_dimension_numbers<[1], [0], [0], [1], [0, 0, 1, 1], [], []>} : vector<32x32xbf16>, vector<32x16xbf16>, vector<32x16xf32> -> vector<32x16xf32>
    %38 = arith.addf %34, %37 : vector<32x16xf32>
    %c0_28 = arith.constant 0 : index
    %c0_29 = arith.constant 0 : index
    %39 = vector.load %arg5[%c0_28, %c0_29] : memref<32x1xf32, #tpu.memory_space<vmem>>, vector<32x1xf32>
    %40 = vector.broadcast %39 : vector<32x1xf32> to vector<32x16xf32>
    %41 = arith.addf %38, %40 : vector<32x16xf32>
    %cst_30 = arith.constant 0.000000e+00 : f32
    %42 = vector.broadcast %cst_30 : f32 to vector<32x16xf32>
    %43 = arith.maximumf %41, %42 : vector<32x16xf32>
    %c0_31 = arith.constant 0 : index
    %c0_32 = arith.constant 0 : index
    %44 = vector.load %arg6[%c0_31, %c0_32] : memref<32x4xbf16, #tpu.memory_space<vmem>>, vector<32x4xbf16>
    %cst_33 = arith.constant dense<0.000000e+00> : vector<32x16xf32>
    %45 = tpu.matmul %44, %2, %cst_33 {dimension_numbers = #tpu.dot_dimension_numbers<[1], [0], [0], [1], [0, 0, 1, 1], [], []>} : vector<32x4xbf16>, vector<4x16xbf16>, vector<32x16xf32> -> vector<32x16xf32>
    %c0_34 = arith.constant 0 : index
    %c0_35 = arith.constant 0 : index
    %46 = vector.load %arg7[%c0_34, %c0_35] : memref<32x1xf32, #tpu.memory_space<vmem>>, vector<32x1xf32>
    %47 = vector.broadcast %46 : vector<32x1xf32> to vector<32x16xf32>
    %48 = arith.addf %45, %47 : vector<32x16xf32>
    %49 = arith.addf %43, %48 : vector<32x16xf32>
    %cst_36 = arith.constant 0.000000e+00 : f32
    %50 = vector.broadcast %cst_36 : f32 to vector<32x16xf32>
    %51 = arith.maximumf %49, %50 : vector<32x16xf32>
    %52 = arith.truncf %51 : vector<32x16xf32> to vector<32x16xbf16>
    %cst_37 = arith.constant 0.000000e+00 : bf16
    %53 = vector.broadcast %cst_37 : bf16 to vector<32x4xbf16>
    %54 = tpu.concatenate %53, %52 in 1 : vector<32x4xbf16>, vector<32x16xbf16> -> vector<32x20xbf16>
    %55 = vector.extract_strided_slice %54 {offsets = [0, 0], sizes = [32, 16], strides = [1, 1]} : vector<32x20xbf16> to vector<32x16xbf16>
    %c0_38 = arith.constant 0 : index
    %c0_39 = arith.constant 0 : index
    %c0_40 = arith.constant 0 : index
    %56 = vector.load %arg8[%c0_38, %c0_39, %c0_40] : memref<3x32x32xbf16, #tpu.memory_space<vmem>>, vector<1x32x32xbf16>
    %57 = vector.shape_cast %56 : vector<1x32x32xbf16> to vector<32x32xbf16>
    %cst_41 = arith.constant dense<0.000000e+00> : vector<32x16xf32>
    %58 = tpu.matmul %57, %55, %cst_41 {dimension_numbers = #tpu.dot_dimension_numbers<[1], [0], [0], [1], [0, 0, 1, 1], [], []>} : vector<32x32xbf16>, vector<32x16xbf16>, vector<32x16xf32> -> vector<32x16xf32>
    %59 = vector.extract_strided_slice %54 {offsets = [0, 2], sizes = [32, 16], strides = [1, 1]} : vector<32x20xbf16> to vector<32x16xbf16>
    %c1_42 = arith.constant 1 : index
    %c0_43 = arith.constant 0 : index
    %c0_44 = arith.constant 0 : index
    %60 = vector.load %arg8[%c1_42, %c0_43, %c0_44] : memref<3x32x32xbf16, #tpu.memory_space<vmem>>, vector<1x32x32xbf16>
    %61 = vector.shape_cast %60 : vector<1x32x32xbf16> to vector<32x32xbf16>
    %cst_45 = arith.constant dense<0.000000e+00> : vector<32x16xf32>
    %62 = tpu.matmul %61, %59, %cst_45 {dimension_numbers = #tpu.dot_dimension_numbers<[1], [0], [0], [1], [0, 0, 1, 1], [], []>} : vector<32x32xbf16>, vector<32x16xbf16>, vector<32x16xf32> -> vector<32x16xf32>
    %63 = arith.addf %58, %62 : vector<32x16xf32>
    %c2_46 = arith.constant 2 : index
    %c0_47 = arith.constant 0 : index
    %c0_48 = arith.constant 0 : index
    %64 = vector.load %arg8[%c2_46, %c0_47, %c0_48] : memref<3x32x32xbf16, #tpu.memory_space<vmem>>, vector<1x32x32xbf16>
    %65 = vector.shape_cast %64 : vector<1x32x32xbf16> to vector<32x32xbf16>
    %cst_49 = arith.constant dense<0.000000e+00> : vector<32x16xf32>
    %66 = tpu.matmul %65, %52, %cst_49 {dimension_numbers = #tpu.dot_dimension_numbers<[1], [0], [0], [1], [0, 0, 1, 1], [], []>} : vector<32x32xbf16>, vector<32x16xbf16>, vector<32x16xf32> -> vector<32x16xf32>
    %67 = arith.addf %63, %66 : vector<32x16xf32>
    %c0_50 = arith.constant 0 : index
    %c0_51 = arith.constant 0 : index
    %68 = vector.load %arg9[%c0_50, %c0_51] : memref<32x1xf32, #tpu.memory_space<vmem>>, vector<32x1xf32>
    %69 = vector.broadcast %68 : vector<32x1xf32> to vector<32x16xf32>
    %70 = arith.addf %67, %69 : vector<32x16xf32>
    %cst_52 = arith.constant 0.000000e+00 : f32
    %71 = vector.broadcast %cst_52 : f32 to vector<32x16xf32>
    %72 = arith.maximumf %70, %71 : vector<32x16xf32>
    %73 = arith.truncf %72 : vector<32x16xf32> to vector<32x16xbf16>
    %cst_53 = arith.constant 0.000000e+00 : bf16
    %74 = vector.broadcast %cst_53 : bf16 to vector<32x4xbf16>
    %75 = tpu.concatenate %74, %73 in 1 : vector<32x4xbf16>, vector<32x16xbf16> -> vector<32x20xbf16>
    %76 = vector.extract_strided_slice %75 {offsets = [0, 0], sizes = [32, 16], strides = [1, 1]} : vector<32x20xbf16> to vector<32x16xbf16>
    %c0_54 = arith.constant 0 : index
    %c0_55 = arith.constant 0 : index
    %c0_56 = arith.constant 0 : index
    %77 = vector.load %arg10[%c0_54, %c0_55, %c0_56] : memref<3x32x32xbf16, #tpu.memory_space<vmem>>, vector<1x32x32xbf16>
    %78 = vector.shape_cast %77 : vector<1x32x32xbf16> to vector<32x32xbf16>
    %cst_57 = arith.constant dense<0.000000e+00> : vector<32x16xf32>
    %79 = tpu.matmul %78, %76, %cst_57 {dimension_numbers = #tpu.dot_dimension_numbers<[1], [0], [0], [1], [0, 0, 1, 1], [], []>} : vector<32x32xbf16>, vector<32x16xbf16>, vector<32x16xf32> -> vector<32x16xf32>
    %80 = vector.extract_strided_slice %75 {offsets = [0, 2], sizes = [32, 16], strides = [1, 1]} : vector<32x20xbf16> to vector<32x16xbf16>
    %c1_58 = arith.constant 1 : index
    %c0_59 = arith.constant 0 : index
    %c0_60 = arith.constant 0 : index
    %81 = vector.load %arg10[%c1_58, %c0_59, %c0_60] : memref<3x32x32xbf16, #tpu.memory_space<vmem>>, vector<1x32x32xbf16>
    %82 = vector.shape_cast %81 : vector<1x32x32xbf16> to vector<32x32xbf16>
    %cst_61 = arith.constant dense<0.000000e+00> : vector<32x16xf32>
    %83 = tpu.matmul %82, %80, %cst_61 {dimension_numbers = #tpu.dot_dimension_numbers<[1], [0], [0], [1], [0, 0, 1, 1], [], []>} : vector<32x32xbf16>, vector<32x16xbf16>, vector<32x16xf32> -> vector<32x16xf32>
    %84 = arith.addf %79, %83 : vector<32x16xf32>
    %c2_62 = arith.constant 2 : index
    %c0_63 = arith.constant 0 : index
    %c0_64 = arith.constant 0 : index
    %85 = vector.load %arg10[%c2_62, %c0_63, %c0_64] : memref<3x32x32xbf16, #tpu.memory_space<vmem>>, vector<1x32x32xbf16>
    %86 = vector.shape_cast %85 : vector<1x32x32xbf16> to vector<32x32xbf16>
    %cst_65 = arith.constant dense<0.000000e+00> : vector<32x16xf32>
    %87 = tpu.matmul %86, %73, %cst_65 {dimension_numbers = #tpu.dot_dimension_numbers<[1], [0], [0], [1], [0, 0, 1, 1], [], []>} : vector<32x32xbf16>, vector<32x16xbf16>, vector<32x16xf32> -> vector<32x16xf32>
    %88 = arith.addf %84, %87 : vector<32x16xf32>
    %c0_66 = arith.constant 0 : index
    %c0_67 = arith.constant 0 : index
    %89 = vector.load %arg11[%c0_66, %c0_67] : memref<32x1xf32, #tpu.memory_space<vmem>>, vector<32x1xf32>
    %90 = vector.broadcast %89 : vector<32x1xf32> to vector<32x16xf32>
    %91 = arith.addf %88, %90 : vector<32x16xf32>
    %cst_68 = arith.constant 0.000000e+00 : f32
    %92 = vector.broadcast %cst_68 : f32 to vector<32x16xf32>
    %93 = arith.maximumf %91, %92 : vector<32x16xf32>
    %94 = arith.addf %93, %51 : vector<32x16xf32>
    %cst_69 = arith.constant 0.000000e+00 : f32
    %95 = vector.broadcast %cst_69 : f32 to vector<32x16xf32>
    %96 = arith.maximumf %94, %95 : vector<32x16xf32>
    %c0_70 = arith.constant 0 : index
    %c0_71 = arith.constant 0 : index
    %97 = vector.load %arg12[%c0_70, %c0_71] : memref<32x1xf32, #tpu.memory_space<vmem>>, vector<32x1xf32>
    %98 = vector.broadcast %97 : vector<32x1xf32> to vector<32x16xf32>
    %99 = arith.mulf %96, %98 : vector<32x16xf32>
    %cst_72 = arith.constant dense<0.000000e+00> : vector<16xf32>
    %100 = vector.multi_reduction <add>, %99, %cst_72 [0] : vector<32x16xf32> to vector<16xf32>
    %101 = vector.shape_cast %100 : vector<16xf32> to vector<1x16xf32>
    %c0_73 = arith.constant 0 : index
    %c0_74 = arith.constant 0 : index
    %102 = vector.load %arg13[%c0_73, %c0_74] : memref<1x1xf32, #tpu.memory_space<vmem>>, vector<1x1xf32>
    %103 = vector.broadcast %102 : vector<1x1xf32> to vector<1x16xf32>
    %104 = arith.addf %101, %103 : vector<1x16xf32>
    %105 = vector.shape_cast %104 : vector<1x16xf32> to vector<1x1x16xf32>
    %c0_75 = arith.constant 0 : index
    %c0_76 = arith.constant 0 : index
    %c0_77 = arith.constant 0 : index
    %106 = vector.load %arg14[%c0_75, %c0_76, %c0_77] : memref<1x1x16xf32, #tpu.memory_space<vmem>>, vector<1x1x16xf32>
    tpu.vector_store %arg14[%c0_75, %c0_76, %c0_77], %105 {strides = array<i32>} : memref<1x1x16xf32, #tpu.memory_space<vmem>>, vector<1x1x16xf32>,
    return
  }
  func.func @transform_0(%arg0: i32) -> (i32, i32, i32) {
    %c0_i32 = arith.constant 0 : i32
    %c0_i32_0 = arith.constant 0 : i32
    %c0_i32_1 = arith.constant 0 : i32
    return %arg0, %c0_i32, %c0_i32_0 : i32, i32, i32
  }
  func.func @transform_1(%arg0: i32) -> (i32, i32, i32) {
    %c0_i32 = arith.constant 0 : i32
    %c0_i32_0 = arith.constant 0 : i32
    %c0_i32_1 = arith.constant 0 : i32
    %c0_i32_2 = arith.constant 0 : i32
    return %c0_i32, %c0_i32_0, %c0_i32_1 : i32, i32, i32
  }
  func.func @transform_2(%arg0: i32) -> (i32, i32) {
    %c0_i32 = arith.constant 0 : i32
    %c0_i32_0 = arith.constant 0 : i32
    %c0_i32_1 = arith.constant 0 : i32
    return %c0_i32, %c0_i32_0 : i32, i32
  }
  func.func @transform_3(%arg0: i32) -> (i32, i32, i32) {
    %c0_i32 = arith.constant 0 : i32
    %c0_i32_0 = arith.constant 0 : i32
    %c0_i32_1 = arith.constant 0 : i32
    %c0_i32_2 = arith.constant 0 : i32
    return %c0_i32, %c0_i32_0, %c0_i32_1 : i32, i32, i32
  }
  func.func @transform_4(%arg0: i32) -> (i32, i32) {
    %c0_i32 = arith.constant 0 : i32
    %c0_i32_0 = arith.constant 0 : i32
    %c0_i32_1 = arith.constant 0 : i32
    return %c0_i32, %c0_i32_0 : i32, i32
  }
  func.func @transform_5(%arg0: i32) -> (i32, i32) {
    %c0_i32 = arith.constant 0 : i32
    %c0_i32_0 = arith.constant 0 : i32
    %c0_i32_1 = arith.constant 0 : i32
    return %c0_i32, %c0_i32_0 : i32, i32
  }
  func.func @transform_6(%arg0: i32) -> (i32, i32) {
    %c0_i32 = arith.constant 0 : i32
    %c0_i32_0 = arith.constant 0 : i32
    %c0_i32_1 = arith.constant 0 : i32
    return %c0_i32, %c0_i32_0 : i32, i32
  }
  func.func @transform_7(%arg0: i32) -> (i32, i32, i32) {
    %c0_i32 = arith.constant 0 : i32
    %c0_i32_0 = arith.constant 0 : i32
    %c0_i32_1 = arith.constant 0 : i32
    %c0_i32_2 = arith.constant 0 : i32
    return %c0_i32, %c0_i32_0, %c0_i32_1 : i32, i32, i32
  }
  func.func @transform_8(%arg0: i32) -> (i32, i32) {
    %c0_i32 = arith.constant 0 : i32
    %c0_i32_0 = arith.constant 0 : i32
    %c0_i32_1 = arith.constant 0 : i32
    return %c0_i32, %c0_i32_0 : i32, i32
  }
  func.func @transform_9(%arg0: i32) -> (i32, i32, i32) {
    %c0_i32 = arith.constant 0 : i32
    %c0_i32_0 = arith.constant 0 : i32
    %c0_i32_1 = arith.constant 0 : i32
    %c0_i32_2 = arith.constant 0 : i32
    return %c0_i32, %c0_i32_0, %c0_i32_1 : i32, i32, i32
  }
  func.func @transform_10(%arg0: i32) -> (i32, i32) {
    %c0_i32 = arith.constant 0 : i32
    %c0_i32_0 = arith.constant 0 : i32
    %c0_i32_1 = arith.constant 0 : i32
    return %c0_i32, %c0_i32_0 : i32, i32
  }
  func.func @transform_11(%arg0: i32) -> (i32, i32) {
    %c0_i32 = arith.constant 0 : i32
    %c0_i32_0 = arith.constant 0 : i32
    %c0_i32_1 = arith.constant 0 : i32
    return %c0_i32, %c0_i32_0 : i32, i32
  }
  func.func @transform_12(%arg0: i32) -> (i32, i32) {
    %c0_i32 = arith.constant 0 : i32
    %c0_i32_0 = arith.constant 0 : i32
    %c0_i32_1 = arith.constant 0 : i32
    return %c0_i32, %c0_i32_0 : i32, i32
  }
  func.func @transform_13(%arg0: i32) -> (i32, i32, i32) {
    %c0_i32 = arith.constant 0 : i32
    %c0_i32_0 = arith.constant 0 : i32
    %c0_i32_1 = arith.constant 0 : i32
    return %arg0, %c0_i32, %c0_i32_0 : i32, i32, i32
  }
}

</mosaic_0001>

<bundles_post_ra>
// kernel: tcn_forward.1
= control target key start
LH: loop header
LB: loop body
LE: loop exit
PB: predicated region body
PF: predicated region fallthrough
CT: control target
= control target key end

     0   :  { %s2097_s0 = inlined_call_operand.vmem [shape: f32[2,4,16], index: 0, kind: input, shape index: {}]   ;;  %s2098_s1 = inlined_call_operand.vmem [shape: bf16[3,32,4], index: 1, kind: input, shape index: {}]   ;;  %s2099_s2 = inlined_call_operand.vmem [shape: f32[32,1], index: 2, kind: input, shape index: {}]   ;;  %s2100_s3 = inlined_call_operand.vmem [shape: bf16[3,32,32], index: 3, kind: input, shape index: {}]   ;;  %s2101_s4 = inlined_call_operand.vmem [shape: f32[32,1], index: 4, kind: input, shape index: {}]   ;;  %s2102_s5 = inlined_call_operand.vmem [shape: bf16[32,4], index: 5, kind: input, shape index: {}]   ;;  %s2103_s6 = inlined_call_operand.vmem [shape: f32[32,1], index: 6, kind: input, shape index: {}]   ;;  %s2104_s7 = inlined_call_operand.vmem [shape: bf16[3,32,32], index: 7, kind: input, shape index: {}]   ;;  %s2105_s8 = inlined_call_operand.vmem [shape: f32[32,1], index: 8, kind: input, shape index: {}]   ;;  %s2106_s9 = inlined_call_operand.vmem [shape: bf16[3,32,32], index: 9, kind: input, shape index: {}]   ;;  %s2107_s10 = inlined_call_operand.vmem [shape: f32[32,1], index: 10, kind: input, shape index: {}]   ;;  %s2108_s11 = inlined_call_operand.vmem [shape: f32[32,1], index: 11, kind: input, shape index: {}]   ;;  %s2109_s12 = inlined_call_operand.<no memory space> [shape: f32[1,1], index: 12, kind: input, shape index: {}]   ;;  %s2110_s13 = inlined_call_operand.hbm [shape: f32[2,1,16], index: 13, kind: output, shape index: {}]  }
   0x1   :  { %2117 = sst [smem:[#allocation6_spill]] %s2097_s0  ;;  %v18_v0 = vstv %s2109_s12 }
   0x2   :  { %2118 = sst [smem:[#allocation7_spill]] %s2098_s1  ;;  %19 = vst [vmem:[#allocation2] sm:$0x1] %v18_v0 }
   0x3   :  { %20 = vsyncpa [#allocation4], 0 }
   0x4   :  { %22 = vsyncpa [#allocation4 + $0x1], 0  ;;  %s1781_s27 = smov 0   ;;  %s1783_s28 = smov 0  }
   0x5   :  { %s1785_s29 = smov 0   ;;  %s1787_s30 = smov 0  }
   0x6 LB: > { %s1802_s12 = sadd.s32 4294967295, %s1701_s30   ;;  %s1384_s14 = sadd.s32 4294967294, %s1701_s30   ;;  %s1701_s30 = sphi %s1787_s30, %s2131_s30   ;;  %s1697_s29 = sphi %s1785_s29, %s2130_s29   ;;  %s1693_s28 = sphi %s1783_s28, %s2129_s28   ;;  %s1689_s27 = sphi %s1781_s27, %s2128_s27  }
   0x7   : > { %s1806_s15 = sadd.s32 1, %s1701_s30   ;;  %s313_s16 = sadd.s32 1, %s1697_s29 }
   0x8   : > { %s310_s17 = ssub.s32 %s1701_s30, %s1806_s15  ;;  %p323_p0 = scmp.ne.s32.totalorder %s1697_s29, %s1693_s28 }
   0x9   : > { %p311_p1 = scmp.eq.s32.totalorder %s310_s17, 0  ;;  %p324_p2 = scmp.eq.s32.totalorder %s1802_s12, 1 }
   0xa   : > { %p329_p3 = scmp.ne.s32.totalorder %s1693_s28, %s1689_s27  ;;  %p330_p4 = scmp.eq.s32.totalorder %s1384_s14, 1 }
   0xb   : > { %s1817_s18 = scalar_select %p311_p1, %s1697_s29, %s313_s16  }
   0xc   : > { %p1819_p5 = por %p324_p2, %p323_p0  ;;  %p1823_p6 = por %p330_p4, %p329_p3 }
   0xd   : > { %p1387_p7 = scmp.ge.s32.totalorder %s1701_s30, 1  ;;  %p391_p8 = scmp.lt.s32.totalorder %s1701_s30, 3 }
   0xf   : > { %p392_p9 = pnand %p1387_p7, %p391_p8 }
  0x10   : > { %p433_p10 = scmp.lt.s32.totalorder (!%p392_p9), %s1802_s12, 1  ;;  %s2121_s0 = sld [smem:[#allocation6_spill]] (!%p392_p9) }
  0x11   : > { %395 = sbr.rel (%p392_p9) target bundleno = 1656 (0x678), region = 72  ;;  %s1703_s26 = smov (!%p392_p9), 2  }
  0x12   : > { %s2111_s14 = smov (!%p392_p9), 127   ;;  %s2122_s1 = sld [smem:[#allocation7_spill]] (!%p392_p9) }
  0x13   : > { %s1325_s23 = scalar_lea.hbm (!%p392_p9), %s2110_s13, %s1802_s12 }
  0x16   : > { %s434_s21 = scalar_select %p433_p10, %s1802_s12, 1  ;;  %vm445_vm0 = vcmask 15360   ;;  %vm478_vm1 = vcmask 1041408   ;;  %vm471_vm2 = vcmask 31744   ;;  %v587_v15 = vld [vmem:[%s2099_s2 + $0x10] sm:$0xff]  ;;  %v585_v16 = vld [vmem:[%s2099_s2] sm:$0xff] }
  0x17   : > { %v1705_v17 = vmov 0   ;;  %v588_v18 = vld [vmem:[%s2099_s2 + $0x18] sm:$0xff]  ;;  %v586_v19 = vld [vmem:[%s2099_s2 + $0x8] sm:$0xff]  ;;  %v1577_v22 = vld [vmem:[%s2102_s5] sm:$0xff]  ;;  %vm668_vm4 = vcmask 261120   ;;  %vm1292_vm6 = vcmask 130048  }
  0x18   : > { %s1388_s22 = sshll.u32 %s434_s21, 2  ;;  %v1569_v8 = vld [vmem:[%s2122_s1 + $0x20] sm:$0xff]  ;;  %v1570_v9 = vld [vmem:[%s2122_s1 + $0x28] sm:$0xff]  ;;  %v1568_v12 = vld [vmem:[%s2122_s1 + $0x18] sm:$0xff]  ;;  %1636 = vset.pattern.permute.xlu1 %v1705_v17  ;;  %1637 = vset.pattern.permute.xlu2 %v1705_v17  ;;  %vm1314_vm7 = vcmask 122880  }
  0x19   : > { %s436_s25 = scalar_lea.vmem %s2121_s0, %s1388_s22  ;;  %v1567_v13 = vld [vmem:[%s2122_s1 + $0x10] sm:$0xff]  ;;  %601 = vperm.xlu1 %1636, %v587_v15   ;;  %591 = vperm.xlu2 %1637, %v585_v16   ;;  %v1565_v20 = vld [vmem:[%s2122_s1] sm:$0xff]  ;;  %v1566_v21 = vld [vmem:[%s2122_s1 + $0x8] sm:$0xff]  ;;  %s1659_s22 = scalar_lea.hbm %s2110_s13, 2 }
  0x1a   : > { %v438_v1 = vld [vmem:[%s436_s25] sm:$0xf]  ;;  %1638 = vset.pattern.permute.xlu0 %v1705_v17  ;;  %v1578_v23 = vld [vmem:[%s2102_s5 + $0x8] sm:$0xff]  ;;  %v777_v59 = vld [vmem:[%s2101_s4 + $0x10] sm:$0xff]  ;;  %s2123_s25 = smov 127  }
  0x1b   : > { %v439_v2 = vpack.c.bf16 %v438_v1, %v438_v1  ;;  %vm1449_vm3 = vmneg %vm445_vm0  ;;  %v813_v15 = vld [vmem:[%s2103_s6 + $0x10] sm:$0xff]  ;;  %v1576_v16 = vld [vmem:[%s2100_s3 + $0x28] sm:$0xff] }
  0x1c   : > { %v812_v17 = vld [vmem:[%s2103_s6 + $0x8] sm:$0xff]  ;;  %vm1966_vm5 = vmneg %vm471_vm2 }
  0x1d   : > { %v441_v3 = vunpack.c.l.b16 %v439_v2  ;;  %v560_v7 = vsel %vm478_vm1, %v439_v2, 0 }
  0x1e   : > { %569 = vmatpush.bf16.msra.mxu2 %v560_v7 }
  0x1f   : > { %v442_v4 = vpack.c.b16 %v441_v3, %v441_v3  ;;  %v814_v3 = vld [vmem:[%s2103_s6 + $0x18] sm:$0xff] }
  0x21   : > { %443 = vrot.lane.b32.xlu0 %v442_v4, %s1703_s26  ;;  %1425 = vmatmul.msk.bf16.vlgmr.msra.gmra.mxu2 %vm471_vm2, %v1569_v8  ;;  %v776_v4 = vld [vmem:[%s2101_s4 + $0x8] sm:$0xff] }
  0x22   : > { %858 = vmatpush.bf16.msrb.mxu2 %v560_v7  ;;  %606 = vperm.xlu1 %1636, %v588_v18  }
  0x23   : > { %596 = vperm.xlu2 %1637, %v586_v19  }
  0x31   : > { %1426 = vmatmul.msk.bf16.gmra.mxu2 %vm471_vm2, %v1570_v9  ;;  %v778_v9 = vld [vmem:[%s2101_s4 + $0x18] sm:$0xff] }
  0x41   : > { %1477 = vmatmul.msk.bf16.vlgmr.msrb.gmra.mxu2 %vm471_vm2, %v1577_v22 }
  0x51   : > { %1478 = vmatmul.msk.bf16.gmra.mxu2 %vm471_vm2, %v1578_v23 }
  0x73   : > { %v592_v30 = vpop.permute.xlu2 %591 }
  0x7d   : > { %v597_v39 = vpop.permute.xlu2 %596 }
  0x8b   : > { %v602_v47 = vpop.permute.xlu1 %601 }
  0x93   : > { %v444_v5 = vpop.permute.xlu0 %443 }
  0x94   : > { %v448_v6 = vsel %vm445_vm0, 0, %v444_v5  ;;  %v607_v58 = vpop.permute.xlu1 %606 }
  0x95   : > { %469 = vrot.lane.b32.xlu0 %v448_v6, %s2111_s14  ;;  %v517_v14 = vsel %vm478_vm1, %v448_v6, 0  ;;  %s2115_s14 = smov 4  }
  0xa4   : > { %v571_v26 = vpop.f32.mrf.mxu2 }
  0xac   : > { %v573_v33 = vpop.f32.mrf.mxu2 }
  0xb4   : > { %v576_v43 = vpop.f32.mrf.mxu2 }
  0xbc   : > { %v578_v55 = vpop.f32.mrf.mxu2 }
 0x107   : > { %v470_v10 = vpop.permute.xlu0 %469 }
 0x108   : > { %v480_v11 = vsel %vm478_vm1, %v470_v10, 0  ;;  %v775_v10 = vld [vmem:[%s2101_s4] sm:$0xff] }
 0x109   : > { %489 = vmatpush.bf16.msra.mxu0 %v480_v11  ;;  %1591 = vmatpush.bf16.msra.mxu1 %v480_v11  ;;  %v811_v11 = vld [vmem:[%s2103_s6] sm:$0xff] }
 0x10c   : > { %1402 = vmatmul.msk.bf16.vlgmr.msra.gmra.mxu1 %vm471_vm2, %v1568_v12  ;;  %1401 = vmatmul.msk.bf16.vlgmr.msra.gmra.mxu0 %vm471_vm2, %v1567_v13  ;;  %v1571_v12 = vld [vmem:[%s2100_s3] sm:$0xff] }
 0x10d   : > { %526 = vmatpush.bf16.msrb.mxu1 %v517_v14  ;;  %v1575_v13 = vld [vmem:[%s2100_s3 + $0x20] sm:$0xff]  ;;  %v1572_v14 = vld [vmem:[%s2100_s3 + $0x8] sm:$0xff] }
 0x11c   : > { %1411 = vmatmul.msk.bf16.vlgmr.msrb.gmra.mxu1 %vm471_vm2, %v1565_v20  ;;  %v1573_v20 = vld [vmem:[%s2100_s3 + $0x10] sm:$0xff] }
 0x12c   : > { %1412 = vmatmul.msk.bf16.gmra.mxu1 %vm471_vm2, %v1566_v21  ;;  %v1574_v21 = vld [vmem:[%s2100_s3 + $0x18] sm:$0xff] }
 0x189   : > { %v496_v24 = vpop.f32.mrf.mxu1  ;;  %v491_v27 = vpop.f32.mrf.mxu0 }
 0x191   : > { %v498_v25 = vpop.f32.mrf.mxu1  ;;  %v493_v34 = vpop.f32.mrf.mxu0 }
 0x199   : > { %v528_v28 = vpop.f32.mrf.mxu1 }
 0x19a   : > { %v529_v29 = vadd.f32 %v528_v28, %v491_v27  ;;  %v860_v27 = vpop.f32.mrf.mxu2 }
 0x19c   : > { %v581_v31 = vadd.f32 %v571_v26, %v529_v29 }
 0x19e   : > { %v609_v32 = vadd.f32 %v592_v30, %v581_v31 }
 0x1a0   : > { %v613_v37 = vmax.f32 %v609_v32, 0.0 }
 0x1a1   : > { %v530_v35 = vpop.f32.mrf.mxu1 }
 0x1a2   : > { %v531_v36 = vadd.f32 %v530_v35, %v493_v34  ;;  %v617_v41 = vpack.c.bf16 %v613_v37, %v613_v37 }
 0x1a4   : > { %v582_v38 = vadd.f32 %v573_v33, %v531_v36  ;;  %v625_v49 = vunpack.c.l.b16 %v617_v41 }
 0x1a6   : > { %v610_v40 = vadd.f32 %v597_v39, %v582_v38  ;;  %v862_v38 = vpop.f32.mrf.mxu2 }
 0x1a8   : > { %v614_v42 = vmax.f32 %v610_v40, 0.0 }
 0x1a9   : > { %v533_v44 = vpop.f32.mrf.mxu1 }
 0x1aa   : > { %v618_v45 = vpack.c.bf16 %v614_v42, %v614_v42  ;;  %v534_v46 = vadd.f32 %v533_v44, %v496_v24 }
 0x1ac   : > { %v583_v48 = vadd.f32 %v576_v43, %v534_v46  ;;  %v626_v50 = vunpack.c.l.b16 %v618_v45 }
 0x1ae   : > { %v629_v51 = vpack.c.b16 %v626_v50, %v625_v49  ;;  %v611_v52 = vadd.f32 %v602_v47, %v583_v48 }
 0x1b0   : > { %631 = vrot.lane.b32.xlu1 %v629_v51, %s1703_s26  ;;  %v615_v56 = vmax.f32 %v611_v52, 0.0 }
 0x1b1   : > { %v535_v53 = vpop.f32.mrf.mxu1 }
 0x1b2   : > { %v536_v54 = vadd.f32 %v535_v53, %v498_v25  ;;  %v619_v61 = vpack.c.bf16 %v615_v56, %v615_v56 }
 0x1b4   : > { %v584_v57 = vadd.f32 %v578_v55, %v536_v54  ;;  %v627_v0 = vunpack.c.l.b16 %v619_v61  ;;  %v865_v55 = vpop.f32.mrf.mxu2 }
 0x1b6   : > { %v612_v60 = vadd.f32 %v607_v58, %v584_v57 }
 0x1b8   : > { %v616_v62 = vmax.f32 %v612_v60, 0.0  ;;  %791 = vperm.xlu1 %1636, %v777_v59  }
 0x1ba   : > { %v620_v63 = vpack.c.bf16 %v616_v62, %v616_v62 }
 0x1bc   : > { %v628_v1 = vunpack.c.l.b16 %v620_v63 }
 0x1be   : > { %v630_v2 = vpack.c.b16 %v628_v1, %v627_v0 }
 0x1c0   : > { %633 = vrot.lane.b32.xlu0 %v630_v2, %s1703_s26  ;;  %758 = vmatpush.bf16.msra.mxu1 %v630_v2  ;;  %s2113_s26 = smov 126  }
 0x1c1   : > { %832 = vperm.xlu1 %1636, %v814_v3  }
 0x1c4   : > { %759 = vmatpush.bf16.msra.mxu1 %v629_v51 }
 0x1c7   : > { %1467 = vmatmul.msk.bf16.vlgmr.msra.gmra.mxu1 %vm668_vm4, %v1575_v13  ;;  %v1037_v13 = vld [vmem:[%s2105_s8 + $0x10] sm:$0xff] }
 0x1c9   : > { %786 = vperm.xlu1 %1636, %v776_v4  }
 0x1d7   : > { %1468 = vmatmul.msk.bf16.gmra.mxu1 %vm668_vm4, %v1576_v16 }
 0x222   : > { %v632_v5 = vpop.permute.xlu1 %631 }
 0x223   : > { %v636_v6 = vsel %vm445_vm0, 0, %v632_v5 }
 0x224   : > { %662 = vrot.lane.b32.xlu0 %v636_v6, %s2123_s25 }
 0x22a   : > { %v792_v23 = vpop.permute.xlu1 %791 }
 0x22c   : > { %827 = vperm.xlu0 %1638, %v813_v15  }
 0x232   : > { %v634_v7 = vpop.permute.xlu0 %633 }
 0x233   : > { %1450 = vmatpush.bf16.msk.msrb.mxu0 %vm1449_vm3, %v634_v7  ;;  %v639_v8 = vsel %vm445_vm0, 0, %v634_v7  ;;  %v833_v30 = vpop.permute.xlu1 %832 }
 0x234   : > { %664 = vrot.lane.b32.xlu2 %v639_v8, %s2123_s25  ;;  %822 = vperm.xlu0 %1638, %v812_v17   ;;  %v867_v8 = vpop.f32.mrf.mxu2 }
 0x237   : > { %1452 = vmatpush.bf16.msk.msrb.mxu0 %vm1449_vm3, %v632_v5 }
 0x23a   : > { %1453 = vmatmul.msk.bf16.vlgmr.msrb.gmra.mxu0 %vm668_vm4, %v1571_v12 }
 0x23b   : > { %v787_v44 = vpop.permute.xlu1 %786 }
 0x23c   : > { %796 = vperm.xlu2 %1637, %v778_v9  }
 0x244   : > { %781 = vperm.xlu2 %1637, %v775_v10   ;;  %v761_v26 = vpop.f32.mrf.mxu1  ;;  %v868_v10 = vadd.f32 %v867_v8, %v833_v30  ;;  %v1583_v30 = vld [vmem:[%s2104_s7 + $0x20] sm:$0xff] }
 0x24a   : > { %1454 = vmatmul.msk.bf16.gmra.mxu0 %vm668_vm4, %v1572_v14 }
 0x24c   : > { %817 = vperm.xlu2 %1637, %v811_v11   ;;  %v763_v36 = vpop.f32.mrf.mxu1 }
 0x254   : > { %v766_v51 = vpop.f32.mrf.mxu1 }
 0x25c   : > { %v768_v5 = vpop.f32.mrf.mxu1 }
 0x28e   : > { %v665_v18 = vpop.permute.xlu2 %664 }
 0x28f   : > { %681 = vmatpush.bf16.msra.mxu3 %v665_v18 }
 0x296   : > { %v663_v19 = vpop.permute.xlu0 %662  ;;  %v797_v22 = vpop.permute.xlu2 %796 }
 0x297   : > { %682 = vmatpush.bf16.msra.mxu3 %v663_v19 }
 0x29a   : > { %1439 = vmatmul.msk.bf16.vlgmr.msra.gmra.mxu3 %vm668_vm4, %v1573_v20  ;;  %v1036_v20 = vld [vmem:[%s2105_s8 + $0x8] sm:$0xff] }
 0x29e   : > { %v782_v25 = vpop.permute.xlu2 %781  ;;  %v828_v31 = vpop.permute.xlu0 %827 }
 0x29f   : > { %v866_v61 = vadd.f32 %v865_v55, %v828_v31  ;;  %v1580_v31 = vld [vmem:[%s2104_s7 + $0x8] sm:$0xff] }
 0x2a6   : > { %v818_v35 = vpop.permute.xlu2 %817  ;;  %v823_v45 = vpop.permute.xlu0 %822 }
 0x2a7   : > { %v861_v40 = vadd.f32 %v860_v27, %v818_v35  ;;  %v863_v49 = vadd.f32 %v862_v38, %v823_v45  ;;  %v1581_v35 = vld [vmem:[%s2104_s7 + $0x10] sm:$0xff] }
 0x2aa   : > { %1440 = vmatmul.msk.bf16.gmra.mxu3 %vm668_vm4, %v1574_v21 }
 0x2b7   : > { %v719_v24 = vpop.f32.mrf.mxu0 }
 0x2bf   : > { %v721_v33 = vpop.f32.mrf.mxu0 }
 0x2c7   : > { %v724_v47 = vpop.f32.mrf.mxu0 }
 0x2cf   : > { %v726_v1 = vpop.f32.mrf.mxu0 }
 0x31d   : > { %v684_v28 = vpop.f32.mrf.mxu3 }
 0x31e   : > { %v720_v29 = vadd.f32 %v719_v24, %v684_v28  ;;  %v1035_v24 = vld [vmem:[%s2105_s8] sm:$0xff]  ;;  %v1038_v28 = vld [vmem:[%s2105_s8 + $0x18] sm:$0xff] }
 0x320   : > { %v771_v32 = vadd.f32 %v761_v26, %v720_v29  ;;  %v1579_v29 = vld [vmem:[%s2104_s7] sm:$0xff] }
 0x322   : > { %v799_v34 = vadd.f32 %v782_v25, %v771_v32  ;;  %v1584_v32 = vld [vmem:[%s2104_s7 + $0x28] sm:$0xff]  ;;  %v1585_v25 = vld [vmem:[%s2106_s9] sm:$0xff] }
 0x324   : > { %v803_v37 = vmax.f32 %v799_v34, 0.0 }
 0x325   : > { %v686_v39 = vpop.f32.mrf.mxu3 }
 0x326   : > { %v722_v41 = vadd.f32 %v721_v33, %v686_v39  ;;  %v870_v42 = vadd.f32 %v861_v40, %v803_v37 }
 0x328   : > { %v772_v43 = vadd.f32 %v763_v36, %v722_v41  ;;  %v1936_v48 = vmax.f32 %v870_v42, 0.0  ;;  %v1582_v36 = vld [vmem:[%s2104_s7 + $0x18] sm:$0xff] }
 0x32a   : > { %v800_v46 = vadd.f32 %v787_v44, %v772_v43  ;;  %v878_v58 = vpack.c.bf16 %v1936_v48, %v1936_v48 }
 0x32c   : > { %v804_v50 = vmax.f32 %v800_v46, 0.0  ;;  %v886_v63 = vunpack.c.l.b16 %v878_v58 }
 0x32d   : > { %v689_v52 = vpop.f32.mrf.mxu3 }
 0x32e   : > { %v871_v53 = vadd.f32 %v863_v49, %v804_v50  ;;  %v725_v54 = vadd.f32 %v724_v47, %v689_v52 }
 0x330   : > { %v1938_v56 = vmax.f32 %v871_v53, 0.0  ;;  %v773_v57 = vadd.f32 %v766_v51, %v725_v54 }
 0x332   : > { %v801_v59 = vadd.f32 %v792_v23, %v773_v57  ;;  %v879_v60 = vpack.c.bf16 %v1938_v56, %v1938_v56 }
 0x334   : > { %v805_v62 = vmax.f32 %v801_v59, 0.0  ;;  %v887_v0 = vunpack.c.l.b16 %v879_v60 }
 0x335   : > { %v691_v2 = vpop.f32.mrf.mxu3 }
 0x336   : > { %v727_v3 = vadd.f32 %v726_v1, %v691_v2  ;;  %v890_v4 = vpack.c.b16 %v887_v0, %v886_v63  ;;  %v872_v6 = vadd.f32 %v866_v61, %v805_v62 }
 0x338   : > { %v774_v7 = vadd.f32 %v768_v5, %v727_v3  ;;  %892 = vrot.lane.b32.xlu2 %v890_v4, %s2115_s14  ;;  %v1945_v11 = vmax.f32 %v872_v6, 0.0 }
 0x33a   : > { %v802_v9 = vadd.f32 %v797_v22, %v774_v7  ;;  %v880_v16 = vpack.c.bf16 %v1945_v11, %v1945_v11 }
 0x33c   : > { %v806_v12 = vmax.f32 %v802_v9, 0.0  ;;  %v888_v18 = vunpack.c.l.b16 %v880_v16 }
 0x33e   : > { %v873_v14 = vadd.f32 %v868_v10, %v806_v12  ;;  %v1224_v10 = vld [vmem:[%s2107_s10] sm:$0xff] }
 0x340   : > { %v1950_v15 = vmax.f32 %v873_v14, 0.0  ;;  %1051 = vperm.xlu2 %1637, %v1037_v13  }
 0x342   : > { %v881_v17 = vpack.c.bf16 %v1950_v15, %v1950_v15 }
 0x344   : > { %v889_v19 = vunpack.c.l.b16 %v881_v17 }
 0x346   : > { %v891_v21 = vpack.c.b16 %v889_v19, %v888_v18  ;;  %v1227_v19 = vld [vmem:[%s2107_s10 + $0x18] sm:$0xff] }
 0x348   : > { %1046 = vperm.xlu2 %1637, %v1036_v20   ;;  %894 = vrot.lane.b32.xlu1 %v891_v21, %s2115_s14  ;;  %s2126_s14 = smov 4  }
 0x349   : > { %1018 = vmatpush.bf16.msrb.mxu1 %v891_v21  ;;  %v1266_v21 = vld [vmem:[%s2108_s11 + $0x10] sm:$0xff] }
 0x34d   : > { %1019 = vmatpush.bf16.msrb.mxu1 %v890_v4 }
 0x350   : > { %1519 = vmatmul.msk.bf16.vlgmr.msrb.gmra.mxu1 %vm668_vm4, %v1583_v30  ;;  %v1225_v30 = vld [vmem:[%s2107_s10 + $0x8] sm:$0xff] }
 0x360   : > { %1520 = vmatmul.msk.bf16.gmra.mxu1 %vm668_vm4, %v1584_v32  ;;  %v1267_v32 = vld [vmem:[%s2108_s11 + $0x18] sm:$0xff] }
 0x392   : > { %v893_v22 = vpop.permute.xlu2 %892 }
 0x393   : > { %v897_v23 = vsel %vm471_vm2, 0, %v893_v22 }
 0x394   : > { %923 = vrot.lane.b32.xlu1 %v897_v23, %s2113_s26 }
 0x39a   : > { %v1052_v41 = vpop.permute.xlu2 %1051 }
 0x39c   : > { %1041 = vperm.xlu1 %1636, %v1035_v24   ;;  %v1226_v24 = vld [vmem:[%s2107_s10 + $0x10] sm:$0xff] }
 0x3a2   : > { %v1047_v52 = vpop.permute.xlu2 %1046 }
 0x3ba   : > { %v895_v26 = vpop.permute.xlu1 %894 }
 0x3bb   : > { %1502 = vmatpush.bf16.msk.msra.mxu0 %vm1966_vm5, %v895_v26  ;;  %v900_v27 = vsel %vm471_vm2, 0, %v895_v26  ;;  %v1265_v26 = vld [vmem:[%s2108_s11 + $0x8] sm:$0xff] }
 0x3bc   : > { %925 = vrot.lane.b32.xlu0 %v900_v27, %s2113_s26  ;;  %s2127_s26 = smov 126  }
 0x3bf   : > { %1504 = vmatpush.bf16.msk.msra.mxu0 %vm1966_vm5, %v893_v22 }
 0x3c2   : > { %1505 = vmatmul.msk.bf16.vlgmr.msra.gmra.mxu0 %vm668_vm4, %v1579_v29  ;;  %v1306_v29 = vld [vmem:[#allocation2] sm:$0x1] }
 0x3c4   : > { %1056 = vperm.xlu0 %1638, %v1038_v28  }
 0x3cd   : > { %v1021_v38 = vpop.f32.mrf.mxu1 }
 0x3d2   : > { %1506 = vmatmul.msk.bf16.gmra.mxu0 %vm668_vm4, %v1580_v31  ;;  %v1264_v31 = vld [vmem:[%s2108_s11] sm:$0xff] }
 0x3d5   : > { %v1023_v46 = vpop.f32.mrf.mxu1 }
 0x3dd   : > { %v1026_v58 = vpop.f32.mrf.mxu1 }
 0x3e5   : > { %v1028_v6 = vpop.f32.mrf.mxu1 }
 0x406   : > { %v924_v34 = vpop.permute.xlu1 %923 }
 0x40e   : > { %v1042_v43 = vpop.permute.xlu1 %1041 }
 0x42e   : > { %v926_v33 = vpop.permute.xlu0 %925 }
 0x42f   : > { %941 = vmatpush.bf16.msrb.mxu3 %v926_v33  ;;  %v1589_v33 = vld [vmem:[%s2106_s9 + $0x20] sm:$0xff] }
 0x433   : > { %942 = vmatpush.bf16.msrb.mxu3 %v924_v34  ;;  %v1586_v34 = vld [vmem:[%s2106_s9 + $0x8] sm:$0xff] }
 0x436   : > { %1491 = vmatmul.msk.bf16.vlgmr.msrb.gmra.mxu3 %vm668_vm4, %v1581_v35  ;;  %v1057_v9 = vpop.permute.xlu0 %1056  ;;  %v1590_v35 = vld [vmem:[%s2106_s9 + $0x28] sm:$0xff] }
 0x43f   : > { %v979_v37 = vpop.f32.mrf.mxu0 }
 0x446   : > { %1492 = vmatmul.msk.bf16.gmra.mxu3 %vm668_vm4, %v1582_v36 }
 0x447   : > { %v981_v44 = vpop.f32.mrf.mxu0 }
 0x44f   : > { %v984_v54 = vpop.f32.mrf.mxu0 }
 0x457   : > { %v986_v3 = vpop.f32.mrf.mxu0 }
 0x4b9   : > { %v944_v39 = vpop.f32.mrf.mxu3 }
 0x4ba   : > { %v980_v40 = vadd.f32 %v979_v37, %v944_v39  ;;  %v1588_v39 = vld [vmem:[%s2106_s9 + $0x18] sm:$0xff] }
 0x4bc   : > { %v1031_v42 = vadd.f32 %v1021_v38, %v980_v40  ;;  %v1587_v38 = vld [vmem:[%s2106_s9 + $0x10] sm:$0xff] }
 0x4be   : > { %v1059_v45 = vadd.f32 %v1042_v43, %v1031_v42 }
 0x4c0   : > { %v1063_v50 = vmax.f32 %v1059_v45, 0.0 }
 0x4c1   : > { %v946_v47 = vpop.f32.mrf.mxu3 }
 0x4c2   : > { %v982_v49 = vadd.f32 %v981_v44, %v946_v47  ;;  %v1067_v55 = vpack.c.bf16 %v1063_v50, %v1063_v50 }
 0x4c4   : > { %v1032_v51 = vadd.f32 %v1023_v46, %v982_v49  ;;  %v1075_v63 = vunpack.c.l.b16 %v1067_v55 }
 0x4c6   : > { %v1060_v53 = vadd.f32 %v1047_v52, %v1032_v51 }
 0x4c8   : > { %v1064_v57 = vmax.f32 %v1060_v53, 0.0 }
 0x4c9   : > { %v949_v59 = vpop.f32.mrf.mxu3 }
 0x4ca   : > { %v1068_v60 = vpack.c.bf16 %v1064_v57, %v1064_v57  ;;  %v985_v61 = vadd.f32 %v984_v54, %v949_v59 }
 0x4cc   : > { %v1033_v62 = vadd.f32 %v1026_v58, %v985_v61  ;;  %v1076_v0 = vunpack.c.l.b16 %v1068_v60 }
 0x4ce   : > { %v1079_v1 = vpack.c.b16 %v1076_v0, %v1075_v63  ;;  %v1061_v2 = vadd.f32 %v1052_v41, %v1033_v62 }
 0x4d0   : > { %1081 = vrot.lane.b32.xlu1 %v1079_v1, %s2126_s14  ;;  %v1065_v7 = vmax.f32 %v1061_v2, 0.0 }
 0x4d1   : > { %v951_v4 = vpop.f32.mrf.mxu3 }
 0x4d2   : > { %v987_v5 = vadd.f32 %v986_v3, %v951_v4  ;;  %v1069_v13 = vpack.c.bf16 %v1065_v7, %v1065_v7 }
 0x4d4   : > { %v1034_v8 = vadd.f32 %v1028_v6, %v987_v5  ;;  %v1077_v17 = vunpack.c.l.b16 %v1069_v13 }
 0x4d6   : > { %v1062_v12 = vadd.f32 %v1057_v9, %v1034_v8 }
 0x4d8   : > { %v1066_v14 = vmax.f32 %v1062_v12, 0.0  ;;  %1230 = vperm.xlu1 %1636, %v1224_v10  }
 0x4da   : > { %v1070_v16 = vpack.c.bf16 %v1066_v14, %v1066_v14 }
 0x4dc   : > { %v1078_v18 = vunpack.c.l.b16 %v1070_v16 }
 0x4de   : > { %v1080_v20 = vpack.c.b16 %v1078_v18, %v1077_v17 }
 0x4e0   : > { %1245 = vperm.xlu1 %1636, %v1227_v19   ;;  %1083 = vrot.lane.b32.xlu0 %v1080_v20, %s2126_s14  ;;  %s431_s14 = sand.u32 1, %s1693_s28  }
 0x4e1   : > { %1207 = vmatpush.bf16.msrb.mxu0 %v1080_v20  ;;  %s432_s24 = scalar_lea.vmem [#allocation3], %s431_s14  ;;  %s1317_s16 = scalar_lea.sflag [#allocation4], %s431_s14 }
 0x4e2   : > { %s1327_s25 = sshll.u32 %s432_s24, 4  ;;  %s1328_s25 = int_to_ptr.vmem [resolvable:$true] %s1327_s25 }
 0x4e5   : > { %1208 = vmatpush.bf16.msrb.mxu0 %v1079_v1 }
 0x4e8   : > { %1280 = vperm.xlu1 %1636, %v1266_v21   ;;  %1561 = vmatmul.msk.bf16.vlgmr.msrb.gmra.mxu0 %vm668_vm4, %v1589_v33 }
 0x4f8   : > { %1562 = vmatmul.msk.bf16.gmra.mxu0 %vm668_vm4, %v1590_v35 }
 0x542   : > { %v1082_v22 = vpop.permute.xlu1 %1081 }
 0x543   : > { %v1086_v23 = vsel %vm471_vm2, 0, %v1082_v22 }
 0x544   : > { %1112 = vrot.lane.b32.xlu0 %v1086_v23, %s2127_s26 }
 0x54a   : > { %v1231_v49 = vpop.permute.xlu1 %1230 }
 0x54c   : > { %1240 = vperm.xlu0 %1638, %v1226_v24  }
 0x552   : > { %v1084_v27 = vpop.permute.xlu0 %1083  ;;  %v1246_v0 = vpop.permute.xlu1 %1245 }
 0x553   : > { %1544 = vmatpush.bf16.msk.msra.mxu3 %vm1966_vm5, %v1084_v27  ;;  %v1089_v28 = vsel %vm471_vm2, 0, %v1084_v27 }
 0x554   : > { %1275 = vperm.xlu0 %1638, %v1265_v26   ;;  %1114 = vrot.lane.b32.xlu2 %v1089_v28, %s2127_s26  ;;  %s1329_s26 = sshll.u32 %s1325_s23, 4  ;;  %s1330_s26 = int_to_ptr.hbm [resolvable:$true] %s1329_s26 }
 0x555   : > { %s1653_s17 = sshra.s32 %s1330_s26, 4  ;;  %s1654_s17 = int_to_ptr.hbm [resolvable:$true] %s1653_s17 }
 0x556   : > { %s1655_s0 = scalar_lea.hbm %s1654_s17, 1  ;;  %p1660_p0 = scmp.lt.s32.totalorder %s1654_s17, %s2110_s13 }
 0x557   : > { %1546 = vmatpush.bf16.msk.msra.mxu3 %vm1966_vm5, %v1082_v22  ;;  %p1656_p11 = scmp.ne.s32.totalorder %s1654_s17, %s1655_s0  ;;  %p1661_p1 = scmp.lt.s32.totalorder %s1659_s22, %s1655_s0 }
 0x559   : > { %p1657_p12 = pnand %p1656_p11, %p1819_p5  ;;  %p1662_p2 = por %p1661_p1, %p1660_p0 }
 0x55a   : > { %1547 = vmatmul.msk.bf16.vlgmr.msra.gmra.mxu3 %vm668_vm4, %v1585_v25  ;;  %v1281_v20 = vpop.permute.xlu1 %1280 }
 0x55b   : > { %p1658_p13 = pneg %p1657_p12 }
 0x55c   : > { %1309 = vperm.xlu0 %1638, %v1306_v29   ;;  %1235 = vperm.xlu2 %1637, %v1225_v30  }
 0x55d   : > { %p1663_p3 = pnand %p1662_p2, %p1658_p13 }
 0x564   : > { %1270 = vperm.xlu2 %1637, %v1264_v31  }
 0x565   : > { %v1210_v41 = vpop.f32.mrf.mxu0 }
 0x56a   : > { %1548 = vmatmul.msk.bf16.gmra.mxu3 %vm668_vm4, %v1586_v34 }
 0x56c   : > { %1285 = vperm.xlu2 %1637, %v1267_v32  }
 0x56d   : > { %v1212_v44 = vpop.f32.mrf.mxu0 }
 0x575   : > { %v1215_v58 = vpop.f32.mrf.mxu0 }
 0x57d   : > { %v1217_v12 = vpop.f32.mrf.mxu0 }
 0x5ae   : > { %v1115_v36 = vpop.permute.xlu2 %1114 }
 0x5af   : > { %1130 = vmatpush.bf16.msra.mxu2 %v1115_v36 }
 0x5b6   : > { %v1113_v37 = vpop.permute.xlu0 %1112  ;;  %v1236_v52 = vpop.permute.xlu2 %1235 }
 0x5b7   : > { %1131 = vmatpush.bf16.msra.mxu2 %v1113_v37 }
 0x5ba   : > { %1533 = vmatmul.msk.bf16.vlgmr.msra.gmra.mxu2 %vm668_vm4, %v1587_v38 }
 0x5be   : > { %v1241_v61 = vpop.permute.xlu0 %1240  ;;  %v1271_v10 = vpop.permute.xlu2 %1270 }
 0x5c6   : > { %v1276_v17 = vpop.permute.xlu0 %1275  ;;  %v1286_v27 = vpop.permute.xlu2 %1285 }
 0x5ca   : > { %1534 = vmatmul.msk.bf16.gmra.mxu2 %vm668_vm4, %v1588_v39 }
 0x5ce   : > { %v1310_v36 = vpop.permute.xlu0 %1309 }
 0x5cf   : > { %v1312_v37 = vperm.slane %v1310_v36, 0 }
 0x5dd   : > { %v1168_v40 = vpop.f32.mrf.mxu3 }
 0x5e5   : > { %v1170_v43 = vpop.f32.mrf.mxu3 }
 0x5ed   : > { %v1173_v54 = vpop.f32.mrf.mxu3 }
 0x5f5   : > { %v1175_v6 = vpop.f32.mrf.mxu3 }
 0x63d   : > { %v1133_v42 = vpop.f32.mrf.mxu2 }
 0x63e   : > { %v1169_v45 = vadd.f32 %v1168_v40, %v1133_v42 }
 0x640   : > { %v1220_v50 = vadd.f32 %v1210_v41, %v1169_v45 }
 0x642   : > { %v1248_v55 = vadd.f32 %v1231_v49, %v1220_v50 }
 0x644   : > { %v1252_v62 = vmax.f32 %v1248_v55, 0.0 }
 0x645   : > { %v1135_v46 = vpop.f32.mrf.mxu2 }
 0x646   : > { %v1171_v47 = vadd.f32 %v1170_v43, %v1135_v46  ;;  %v1256_v3 = vadd.f32 %v1252_v62, %v1936_v48 }
 0x648   : > { %v1221_v51 = vadd.f32 %v1212_v44, %v1171_v47  ;;  %v1260_v13 = vmax.f32 %v1256_v3, 0.0 }
 0x64a   : > { %v1249_v53 = vadd.f32 %v1236_v52, %v1221_v51 }
 0x64c   : > { %v1253_v59 = vmax.f32 %v1249_v53, 0.0 }
 0x64d   : > { %v1138_v57 = vpop.f32.mrf.mxu2 }
 0x64e   : > { %v1174_v60 = vadd.f32 %v1173_v54, %v1138_v57  ;;  %v1257_v1 = vadd.f32 %v1253_v59, %v1938_v56  ;;  %v1288_v56 = vmul.f32 %v1271_v10, %v1260_v13 }
 0x650   : > { %v1222_v63 = vadd.f32 %v1215_v58, %v1174_v60  ;;  %v1261_v7 = vmax.f32 %v1257_v1, 0.0 }
 0x652   : > { %v1250_v2 = vadd.f32 %v1241_v61, %v1222_v63  ;;  %v1289_v18 = vmul.f32 %v1276_v17, %v1261_v7 }
 0x654   : > { %v1254_v4 = vmax.f32 %v1250_v2, 0.0  ;;  %v1294_v22 = vsel %vm1292_vm6, %v1289_v18, 0.0 }
 0x655   : > { %v1140_v5 = vpop.f32.mrf.mxu2 }
 0x656   : > { %v1258_v8 = vadd.f32 %v1254_v4, %v1945_v11  ;;  %v1176_v9 = vadd.f32 %v1175_v6, %v1140_v5  ;;  %v1293_v11 = vsel %vm1292_vm6, %v1288_v56, 0.0 }
 0x657   : > { %v1295_v28 = vadd.f32 %v1294_v22, %v1293_v11 }
 0x658   : > { %v1262_v14 = vmax.f32 %v1258_v8, 0.0  ;;  %v1223_v16 = vadd.f32 %v1217_v12, %v1176_v9 }
 0x65a   : > { %v1251_v19 = vadd.f32 %v1246_v0, %v1223_v16  ;;  %v1290_v21 = vmul.f32 %v1281_v20, %v1262_v14 }
 0x65c   : > { %v1255_v48 = vmax.f32 %v1251_v19, 0.0  ;;  %v1296_v24 = vsel %vm1292_vm6, %v1290_v21, 0.0 }
 0x65d   : > { %v1297_v30 = vadd.f32 %v1296_v24, %v1295_v28 }
 0x65e   : > { %v1259_v23 = vadd.f32 %v1255_v48, %v1950_v15 }
 0x660   : > { %v1263_v26 = vmax.f32 %v1259_v23, 0.0 }
 0x662   : > { %v1291_v29 = vmul.f32 %v1286_v27, %v1263_v26 }
 0x664   : > { %v1298_v31 = vsel %vm1292_vm6, %v1291_v29, 0.0 }
 0x665   : > { %v1299_v32 = vadd.f32 %v1298_v31, %v1297_v30 }
 0x667   : > { %v1300_v25 = vrot.slane %v1299_v32, 4 }
 0x669   : > { %v1301_v33 = vadd.f32 %v1300_v25, %v1299_v32 }
 0x66b   : > { %v1302_v34 = vrot.slane %v1301_v33, 2 }
 0x66d   : > { %v1303_v35 = vadd.f32 %v1302_v34, %v1301_v33 }
 0x66f   : > { %v1304_v15 = vrot.slane %v1303_v35, 1 }
 0x671   : > { %v1305_v38 = vadd.f32 %v1304_v15, %v1303_v35 }
 0x673   : > { %v1313_v39 = vadd.f32 %v1312_v37, %v1305_v38 }
 0x675   : > { %1315 = vst.msk [vmem:[%s432_s24] sm:$0x1] %vm1314_vm7, %v1313_v39 }
 0x676   : > { %1666 = shalt.err (!%p1663_p3)
}
 0x677   : > { %1592 = dma.vmem_to_hbm [thread:$0]  (%p1819_p5), %s1328_s25, 16, %s1330_s26, %s1317_s16  }
 0x678 PF: > { %p1598_p4 = scmp.ge.s32.totalorder %s1701_s30, 2  ;;  %s1341_s14 = sand.u32 1, %s1689_s27  }
 0x679   : > { %s1342_s24 = scalar_lea.sflag [#allocation4], %s1341_s14 }
 0x67a   : > { %p1595_p7 = pnand %p1598_p4, %p1823_p6 }
 0x67c   : > { %p1596_p8 = pneg %p1595_p7 }
 0x67e   : > { %1684 = dma.done.wait (%p1596_p8), %s1342_s24, 16  }
 0x67f   : > { %1686 = vsyncadd (%p1596_p8), %s1342_s24, 4294967280  ;;  %p25_p9 = scmp.ge.s32.totalorder %s1806_s15, 4   ;;  %s2128_s27 = smov %s1693_s28 }
 0x680   : > { %s2129_s28 = smov %s1697_s29  ;;  %s2130_s29 = smov %s1817_s18 }
 0x681   : > { %s2131_s30 = smov %s1806_s15  ;;  %27 = sbr.rel (!%p25_p9) target bundleno = 6 (0x6), region = 115 }
 0x686   :  { %1347 = vsyncpa [#allocation4], 1 }
 0x687   :  { %1349 = vsyncpa [#allocation4 + $0x1], 1 }

</bundles_post_ra>
